<compile_context>
chip_gen: v7x
topology: tpu7x:2x2x1
jax: 0.10.0
libtpu: 0.0.40
codegen_flags: <defaults>
</compile_context>

<pallas_src>
import math

import jax
import jax.numpy as jnp
from jax.experimental import pallas as pl
from jax.experimental.pallas import tpu as pltpu


def _round_up(x, m):
    return (x + m - 1) // m * m


def _gelu_erf(x):
    # Exact-erf GELU: matches torch.nn.GELU() default numerics.
    # TODO(synk): tanh-approx GELU would run on the EUP (free VLIW slot) but
    # changes numerics vs. the torch module, so it is not used here.
    return 0.5 * x * (1.0 + jax.lax.erf(x * (1.0 / math.sqrt(2.0))))


# ---------------------------------------------------------------------------
# Kernels
# ---------------------------------------------------------------------------

def _mlp_kernel_resident(x_ref, w1_ref, b1_ref, w2_ref, b2_ref, o_ref):
    """1-D grid over M; full (lane-padded) weights resident in VMEM."""
    x = x_ref[...].astype(jnp.bfloat16)           # in-VMEM cast, no HBM pass
    h = jnp.dot(x, w1_ref[...], preferred_element_type=jnp.float32)
    h = _gelu_erf(h + b1_ref[...])                # f32 epilogue (safe on v5e)
    o = jnp.dot(h.astype(w2_ref.dtype), w2_ref[...],
                preferred_element_type=jnp.float32)
    o_ref[...] = (o + b2_ref[...]).astype(o_ref.dtype)


def _mlp_kernel_htiled(x_ref, w1_ref, b1_ref, w2_ref, b2_ref, o_ref, acc_ref):
    """2-D grid (M tiles x H tiles); f32 accumulator over the hidden axis."""
    hi = pl.program_id(1)

    @pl.when(hi == 0)
    def _():
        acc_ref[...] = jnp.zeros_like(acc_ref)

    x = x_ref[...].astype(jnp.bfloat16)
    h = jnp.dot(x, w1_ref[...], preferred_element_type=jnp.float32)
    h = _gelu_erf(h + b1_ref[...])
    acc_ref[...] += jnp.dot(h.astype(w2_ref.dtype), w2_ref[...],
                            preferred_element_type=jnp.float32)

    @pl.when(hi == pl.num_programs(1) - 1)
    def _():
        o_ref[...] = (acc_ref[...] + b2_ref[...]).astype(o_ref.dtype)


# ---------------------------------------------------------------------------
# Host-side wrappers
# ---------------------------------------------------------------------------

def prepare_mlp_params(w1, b1, w2, b2):
    """One-time weight prep (call once, reuse across forwards).

    Casts weights to bf16 for the MXU and zero-pads the hidden (H) and output
    (O) feature dims to lane-dense multiples of 128. Zero padding is exact:
    gelu(0 + 0) = 0 and the padded fc2 rows are 0, so padded hidden channels
    contribute nothing; padded output columns are sliced off after the kernel.
    """
    C, H = w1.shape
    H2, O = w2.shape
    assert H2 == H and b1.shape == (H,) and b2.shape == (O,)
    H_p = _round_up(H, 128)
    O_p = _round_up(O, 128)

    w1b = w1.astype(jnp.bfloat16)
    w2b = w2.astype(jnp.bfloat16)
    b1f = b1.astype(jnp.float32).reshape(1, H)
    b2f = b2.astype(jnp.float32).reshape(1, O)
    if H_p != H:
        w1b = jnp.pad(w1b, ((0, 0), (0, H_p - H)))
        b1f = jnp.pad(b1f, ((0, 0), (0, H_p - H)))
        w2b = jnp.pad(w2b, ((0, H_p - H), (0, 0)))
    if O_p != O:
        w2b = jnp.pad(w2b, ((0, 0), (0, O_p - O)))
        b2f = jnp.pad(b2f, ((0, 0), (0, O_p - O)))
    return {"w1": w1b, "b1": b1f, "w2": w2b, "b2": b2f,
            "C": C, "H": H, "O": O, "H_p": H_p, "O_p": O_p}


def _vmem_capacity_bytes():
    # Capability probe only (never wraps the pallas_call). Conservative
    # fallback = smallest per-core VMEM across supported chips (v7x, 64 MiB).
    try:
        cap = getattr(pltpu.get_tpu_info(), "vmem_capacity_bytes", None)
        if cap:
            return int(cap)
    except Exception:
        pass
    return 64 * 1024 * 1024


def mlp_pallas(x, params, *, force_htiled=False):
    """x: (B, N, C) float array. params: output of prepare_mlp_params."""
    B, N, C = x.shape
    assert C == params["C"], "in_features mismatch"
    H_p, O_p, O = params["H_p"], params["O_p"], params["O"]
    M = B * N
    out_dtype = x.dtype
    x_isz = jnp.dtype(x.dtype).itemsize
    o_isz = jnp.dtype(out_dtype).itemsize

    # Metadata-only reshape; no pad, no cast, no extra HBM pass over x.
    x2d = x.reshape(M, C)

    cap = _vmem_capacity_bytes()
    budget = int(cap * 0.85)                     # headroom for compiler/runtime
    big_vmem = cap >= 96 * 1024 * 1024           # v5e/v6e (128 MiB) vs v7x

    # ---------------- resident-weight candidate ----------------
    tile_m_res = _round_up(max(8, min(512 if big_vmem else 256,
                                      _round_up(M, 8))), 8)

    def est_resident(tm):
        return int(
            2 * (C * H_p + H_p * O_p) * 2        # bf16 weights, 2 pipeline bufs
            + 2 * (H_p + O_p) * 4                # biases
            + 2 * tm * C * x_isz                 # x tiles (double-buffered)
            + 2 * tm * O_p * o_isz               # out tiles (double-buffered)
            + tm * H_p * (4 + 2)                 # f32 hidden + bf16 copy
            + tm * O_p * 4                       # f32 fc2 result before cast
        )

    use_resident = (not force_htiled) and est_resident(tile_m_res) <= budget

    flops = int(2 * M * (C * H_p + H_p * O_p))
    transcendentals = int(M * H_p)               # one erf per hidden activation

    if use_resident:
        tile_m = tile_m_res
        vmem_limit = int(min(max(est_resident(tile_m) * 6 // 5,
                                 32 * 1024 * 1024), budget))
        bytes_accessed = int(M * C * x_isz + (C * H_p + H_p * O_p) * 2
                             + (H_p + O_p) * 4 + M * O_p * o_isz)
        call = pl.pallas_call(
            _mlp_kernel_resident,
            out_shape=jax.ShapeDtypeStruct((M, O_p), out_dtype),
            grid_spec=pltpu.PrefetchScalarGridSpec(
                num_scalar_prefetch=0,
                grid=(pl.cdiv(M, tile_m),),
                in_specs=[
                    pl.BlockSpec((tile_m, C), lambda i: (i, 0)),    # x rows
                    pl.BlockSpec((C, H_p), lambda i: (0, 0)),       # fc1 W
                    pl.BlockSpec((1, H_p), lambda i: (0, 0)),       # fc1 b
                    pl.BlockSpec((H_p, O_p), lambda i: (0, 0)),     # fc2 W
                    pl.BlockSpec((1, O_p), lambda i: (0, 0)),       # fc2 b
                ],
                out_specs=pl.BlockSpec((tile_m, O_p), lambda i: (i, 0)),
            ),
            compiler_params=pltpu.CompilerParams(
                dimension_semantics=("parallel",),
                vmem_limit_bytes=vmem_limit,
            ),
            cost_estimate=pl.CostEstimate(
                flops=flops, transcendentals=transcendentals,
                bytes_accessed=bytes_accessed),
        )
    else:
        # H-reduction path: weights streamed per (M tile, H tile).
        tile_h = 128
        for cand in (512, 256, 128):
            if H_p % cand == 0:
                tile_h = cand
                break
        # Roofline-sized tile_m so per-M-tile weight re-streaming stays
        # MXU-bound; shrink only if VMEM forces it.
        tile_m = _round_up(max(8, min(1024 if big_vmem else 512,
                                      _round_up(M, 8))), 8)

        def est_htiled(tm):
            return int(
                2 * C * tile_h * 2               # fc1 weight blocks
                + 2 * tile_h * O_p * 2           # fc2 weight blocks
                + 2 * tile_h * 4 + 2 * O_p * 4   # bias blocks
                + 2 * tm * C * x_isz             # x tiles
                + 2 * tm * O_p * o_isz           # out tiles
                + tm * O_p * 4                   # f32 accumulator scratch
                + tm * tile_h * (4 + 2)          # f32 hidden + bf16 copy
            )

        while tile_m > 64 and est_htiled(tile_m) > budget:
            tile_m = _round_up(tile_m // 2, 8)

        n_m = pl.cdiv(M, tile_m)
        vmem_limit = int(min(max(est_htiled(tile_m) * 6 // 5,
                                 32 * 1024 * 1024), budget))
        bytes_accessed = int(M * C * x_isz
                             + n_m * (C * H_p + H_p * O_p) * 2   # re-streamed
                             + (H_p + O_p) * 4 + M * O_p * o_isz)
        call = pl.pallas_call(
            _mlp_kernel_htiled,
            out_shape=jax.ShapeDtypeStruct((M, O_p), out_dtype),
            grid_spec=pltpu.PrefetchScalarGridSpec(
                num_scalar_prefetch=0,
                grid=(n_m, H_p // tile_h),
                in_specs=[
                    pl.BlockSpec((tile_m, C), lambda i, h: (i, 0)),    # x rows
                    pl.BlockSpec((C, tile_h), lambda i, h: (0, h)),    # fc1 W
                    pl.BlockSpec((1, tile_h), lambda i, h: (0, h)),    # fc1 b
                    pl.BlockSpec((tile_h, O_p), lambda i, h: (h, 0)),  # fc2 W
                    pl.BlockSpec((1, O_p), lambda i, h: (0, 0)),       # fc2 b
                ],
                out_specs=pl.BlockSpec((tile_m, O_p), lambda i, h: (i, 0)),
                scratch_shapes=[pltpu.VMEM((tile_m, O_p), jnp.float32)],
            ),
            compiler_params=pltpu.CompilerParams(
                dimension_semantics=("parallel", "arbitrary"),
                vmem_limit_bytes=vmem_limit,
            ),
            cost_estimate=pl.CostEstimate(
                flops=flops, transcendentals=transcendentals,
                bytes_accessed=bytes_accessed),
        )

    out2d = call(x2d, params["w1"], params["b1"], params["w2"], params["b2"])
    if O_p != O:
        out2d = out2d[:, :O]
    return out2d.reshape(B, N, O)


def init_mlp_params(key, in_features, hidden_features, out_features,
                    dtype=jnp.float32):
    """Deterministic init mimicking torch.nn.Linear defaults (pre-transposed)."""
    k1, k2, k3, k4 = jax.random.split(key, 4)
    lim1 = 1.0 / math.sqrt(in_features)
    lim2 = 1.0 / math.sqrt(hidden_features)
    w1 = jax.random.uniform(k1, (in_features, hidden_features), dtype, -lim1, lim1)
    b1 = jax.random.uniform(k2, (hidden_features,), dtype, -lim1, lim1)
    w2 = jax.random.uniform(k3, (hidden_features, out_features), dtype, -lim2, lim2)
    b2 = jax.random.uniform(k4, (out_features,), dtype, -lim2, lim2)
    return w1, b1, w2, b2


if __name__ == "__main__":
    key = jax.random.PRNGKey(0)

    def run_case(B, N, C, H, O, force_htiled):
        kx, kp = jax.random.split(jax.random.fold_in(key, 131 * C + H))
        x = jax.random.normal(kx, (B, N, C), dtype=jnp.float32)
        w1, b1, w2, b2 = init_mlp_params(kp, C, H, O)
        params = prepare_mlp_params(w1, b1, w2, b2)   # one-time prep

        out = mlp_pallas(x, params, force_htiled=force_htiled)
        out = jax.block_until_ready(out)
        assert out.shape == (B, N, O)

        x2 = x.reshape(-1, C)
        # Reference 1: same mixed precision (bf16 MXU inputs, f32 accumulation).
        xb = x2.astype(jnp.bfloat16)
        h = jnp.dot(xb, w1.astype(jnp.bfloat16),
                    preferred_element_type=jnp.float32) + b1
        h = 0.5 * h * (1.0 + jax.lax.erf(h / jnp.sqrt(2.0)))
        ref_m = (jnp.dot(h.astype(jnp.bfloat16), w2.astype(jnp.bfloat16),
                         preferred_element_type=jnp.float32) + b2).reshape(B, N, O)
        # Reference 2: pure f32 (exact torch module semantics).
        hf = x2 @ w1 + b1
        hf = 0.5 * hf * (1.0 + jax.lax.erf(hf / jnp.sqrt(2.0)))
        ref_f = (hf @ w2 + b2).reshape(B, N, O)

        assert jnp.allclose(out, ref_m, atol=3e-3, rtol=3e-3), (C, H, O, force_htiled)
        assert jnp.allclose(out, ref_f, atol=5e-2, rtol=5e-2), (C, H, O, force_htiled)

    # Resident-weight path (mlp_ratio=4, out_features=in_features).
    run_case(B=2, N=8, C=32, H=128, O=32, force_htiled=False)
    # H-reduction (accumulator) path, forced at small scale to exercise it.
    run_case(B=2, N=8, C=128, H=1024, O=128, force_htiled=True)

    print("KERNEL_OK")
</pallas_src>

<mosaic_0001>
module attributes {stable_mosaic.version = 11 : i64} {
  func.func @_mlp_kernel_resident(%arg0: i32, %arg1: memref<16x32xf32, #tpu.memory_space<vmem>>, %arg2: memref<32x128xbf16, #tpu.memory_space<vmem>>, %arg3: memref<1x128xf32, #tpu.memory_space<vmem>>, %arg4: memref<128x128xbf16, #tpu.memory_space<vmem>>, %arg5: memref<1x128xf32, #tpu.memory_space<vmem>>, %arg6: memref<16x128xf32, #tpu.memory_space<vmem>>) attributes {dimension_semantics = [#tpu.dimension_semantics<parallel>], iteration_bounds = array<i64: 1>, scalar_prefetch = 0 : i64, scratch_operands = 0 : i64, tpu.core_type = #tpu.core_type<tc>, window_params = [{transform_indices = @transform_0, window_bounds = array<i64: 16, 32>}, {pipeline_mode = #tpu.pipeline_mode<synchronous>, transform_indices = @transform_1, window_bounds = array<i64: 32, 128>}, {pipeline_mode = #tpu.pipeline_mode<synchronous>, transform_indices = @transform_2, window_bounds = array<i64: 1, 128>}, {pipeline_mode = #tpu.pipeline_mode<synchronous>, transform_indices = @transform_3, window_bounds = array<i64: 128, 128>}, {pipeline_mode = #tpu.pipeline_mode<synchronous>, transform_indices = @transform_4, window_bounds = array<i64: 1, 128>}, {transform_indices = @transform_5, window_bounds = array<i64: 16, 128>}]} {
    %c0 = arith.constant 0 : index
    %c0_0 = arith.constant 0 : index
    %0 = vector.load %arg1[%c0, %c0_0] : memref<16x32xf32, #tpu.memory_space<vmem>>, vector<16x32xf32>
    %1 = arith.truncf %0 : vector<16x32xf32> to vector<16x32xbf16>
    %c0_1 = arith.constant 0 : index
    %c0_2 = arith.constant 0 : index
    %2 = vector.load %arg2[%c0_1, %c0_2] : memref<32x128xbf16, #tpu.memory_space<vmem>>, vector<32x128xbf16>
    %cst = arith.constant dense<0.000000e+00> : vector<16x128xf32>
    %3 = tpu.matmul %1, %2, %cst {dimension_numbers = #tpu.dot_dimension_numbers<[1], [0], [0], [1], [0, 0, 1, 1], [], []>} : vector<16x32xbf16>, vector<32x128xbf16>, vector<16x128xf32> -> vector<16x128xf32>
    %c0_3 = arith.constant 0 : index
    %c0_4 = arith.constant 0 : index
    %4 = vector.load %arg3[%c0_3, %c0_4] : memref<1x128xf32, #tpu.memory_space<vmem>>, vector<1x128xf32>
    %5 = vector.broadcast %4 : vector<1x128xf32> to vector<16x128xf32>
    %6 = arith.addf %3, %5 : vector<16x128xf32>
    %cst_5 = arith.constant 5.000000e-01 : f32
    %7 = vector.broadcast %cst_5 : f32 to vector<16x128xf32>
    %8 = arith.mulf %7, %6 : vector<16x128xf32>
    %cst_6 = arith.constant 0.707106769 : f32
    %9 = vector.broadcast %cst_6 : f32 to vector<16x128xf32>
    %10 = arith.mulf %6, %9 : vector<16x128xf32>
    %11 = math.erf %10 : vector<16x128xf32>
    %cst_7 = arith.constant 1.000000e+00 : f32
    %12 = vector.broadcast %cst_7 : f32 to vector<16x128xf32>
    %13 = arith.addf %12, %11 : vector<16x128xf32>
    %14 = arith.mulf %8, %13 : vector<16x128xf32>
    %15 = arith.truncf %14 : vector<16x128xf32> to vector<16x128xbf16>
    %c0_8 = arith.constant 0 : index
    %c0_9 = arith.constant 0 : index
    %16 = vector.load %arg4[%c0_8, %c0_9] : memref<128x128xbf16, #tpu.memory_space<vmem>>, vector<128x128xbf16>
    %cst_10 = arith.constant dense<0.000000e+00> : vector<16x128xf32>
    %17 = tpu.matmul %15, %16, %cst_10 {dimension_numbers = #tpu.dot_dimension_numbers<[1], [0], [0], [1], [0, 0, 1, 1], [], []>} : vector<16x128xbf16>, vector<128x128xbf16>, vector<16x128xf32> -> vector<16x128xf32>
    %c0_11 = arith.constant 0 : index
    %c0_12 = arith.constant 0 : index
    %18 = vector.load %arg5[%c0_11, %c0_12] : memref<1x128xf32, #tpu.memory_space<vmem>>, vector<1x128xf32>
    %19 = vector.broadcast %18 : vector<1x128xf32> to vector<16x128xf32>
    %20 = arith.addf %17, %19 : vector<16x128xf32>
    %c0_13 = arith.constant 0 : index
    %c0_14 = arith.constant 0 : index
    %21 = vector.load %arg6[%c0_13, %c0_14] : memref<16x128xf32, #tpu.memory_space<vmem>>, vector<16x128xf32>
    tpu.vector_store %arg6[%c0_13, %c0_14], %20 {strides = array<i32>} : memref<16x128xf32, #tpu.memory_space<vmem>>, vector<16x128xf32>,
    return
  }
  func.func @transform_0(%arg0: i32) -> (i32, i32) {
    %c0_i32 = arith.constant 0 : i32
    %c0_i32_0 = arith.constant 0 : i32
    return %arg0, %c0_i32 : i32, i32
  }
  func.func @transform_1(%arg0: i32) -> (i32, i32) {
    %c0_i32 = arith.constant 0 : i32
    %c0_i32_0 = arith.constant 0 : i32
    %c0_i32_1 = arith.constant 0 : i32
    return %c0_i32, %c0_i32_0 : i32, i32
  }
  func.func @transform_2(%arg0: i32) -> (i32, i32) {
    %c0_i32 = arith.constant 0 : i32
    %c0_i32_0 = arith.constant 0 : i32
    %c0_i32_1 = arith.constant 0 : i32
    return %c0_i32, %c0_i32_0 : i32, i32
  }
  func.func @transform_3(%arg0: i32) -> (i32, i32) {
    %c0_i32 = arith.constant 0 : i32
    %c0_i32_0 = arith.constant 0 : i32
    %c0_i32_1 = arith.constant 0 : i32
    return %c0_i32, %c0_i32_0 : i32, i32
  }
  func.func @transform_4(%arg0: i32) -> (i32, i32) {
    %c0_i32 = arith.constant 0 : i32
    %c0_i32_0 = arith.constant 0 : i32
    %c0_i32_1 = arith.constant 0 : i32
    return %c0_i32, %c0_i32_0 : i32, i32
  }
  func.func @transform_5(%arg0: i32) -> (i32, i32) {
    %c0_i32 = arith.constant 0 : i32
    %c0_i32_0 = arith.constant 0 : i32
    return %arg0, %c0_i32 : i32, i32
  }
}

</mosaic_0001>

<bundles_post_ra>
// kernel: tpu_custom_call.1
= control target key start
LH: loop header
LB: loop body
LE: loop exit
PB: predicated region body
PF: predicated region fallthrough
CT: control target
= control target key end

     0   :  { %10 = vsyncpa [#allocation3], 0  ;;  %s554_s0 = inlined_call_operand.hbm [shape: f32[16,32], index: 0, kind: input, shape index: {}]   ;;  %s555_s1 = inlined_call_operand.hbm [shape: bf16[32,128], index: 1, kind: input, shape index: {}]   ;;  %s556_s2 = inlined_call_operand.vmem [shape: f32[1,128], index: 2, kind: input, shape index: {}]   ;;  %s557_s3 = inlined_call_operand.hbm [shape: bf16[128,128], index: 3, kind: input, shape index: {}]   ;;  %s558_s4 = inlined_call_operand.vmem [shape: f32[1,128], index: 4, kind: input, shape index: {}]   ;;  %s559_s5 = inlined_call_operand.hbm [shape: f32[16,128], index: 5, kind: output, shape index: {}]  }
   0x1   :  { %11 = vsyncpa [#allocation6], 0 }
   0x2   :  { %12 = vsyncpa [#allocation4], 0  ;;  %s448_s18 = smov [#allocation5]   ;;  %s354_s22 = scalar_lea.hbm %s555_s1, 256 }
   0x3   :  { %s30_s19 = sshll.u32 %s448_s18, 4  ;;  %p355_p0 = scmp.ne.s32.totalorder %s555_s1, %s354_s22  ;;  %s31_s19 = int_to_ptr.vmem [resolvable:$true] %s30_s19 }
   0x4   :  { %p358_p1 = scmp.lt.u32.totalorder %s354_s22, %s555_s1 }
   0x6   :  { %p360_p2 = pnand %p358_p1, %p355_p0 }
   0x8   :  { %363 = shalt.err (!%p360_p2)
}
   0x9   :  { %s364_s27 = scalar_lea.vmem %s31_s19, 256  ;;  %p369_p4 = scmp.lt.s32.totalorder %s31_s19, %s31_s19 }
   0xa   :  { %p365_p3 = scmp.ne.s32.totalorder %s31_s19, %s364_s27  ;;  %p370_p5 = scmp.lt.s32.totalorder %s364_s27, %s364_s27 }
   0xc   :  { %p371_p6 = por %p370_p5, %p369_p4 }
   0xe   :  { %p372_p7 = pnand %p371_p6, %p365_p3 }
  0x10   :  { %375 = shalt.err (!%p372_p7)
}
  0x11   :  { %s449_s28 = smov 64   ;;  %s450_s29 = smov 4  }
  0x12   :  { %36 = dma.hbm_to_vmem [thread:$0]  %s555_s1, 256, %s31_s19, [#allocation6], %s449_s28, %s449_s28, %s450_s29  }
  0x13   :  { %s451_s7 = smov [#allocation2]   ;;  %s376_s11 = scalar_lea.hbm %s554_s0, 256 }
  0x14   :  { %s18_s8 = sshll.u32 %s451_s7, 4  ;;  %p377_p8 = scmp.ne.s32.totalorder %s554_s0, %s376_s11  ;;  %s19_s8 = int_to_ptr.vmem [resolvable:$true] %s18_s8 }
  0x15   :  { %p380_p9 = scmp.lt.u32.totalorder %s376_s11, %s554_s0 }
  0x17   :  { %p382_p10 = pnand %p380_p9, %p377_p8 }
  0x19   :  { %385 = shalt.err (!%p382_p10)
}
  0x1a   :  { %s386_s16 = scalar_lea.vmem %s19_s8, 256  ;;  %p391_p12 = scmp.lt.s32.totalorder %s19_s8, %s19_s8 }
  0x1b   :  { %p387_p11 = scmp.ne.s32.totalorder %s19_s8, %s386_s16  ;;  %p392_p13 = scmp.lt.s32.totalorder %s386_s16, %s386_s16 }
  0x1d   :  { %p393_p0 = por %p392_p13, %p391_p12 }
  0x1f   :  { %p394_p1 = pnand %p393_p0, %p387_p11 }
  0x21   :  { %397 = shalt.err (!%p394_p1)
}
  0x22   :  { %s452_s1 = smov 128   ;;  %s453_s17 = smov 8  }
  0x23   :  { %24 = dma.hbm_to_vmem [thread:$0]  %s554_s0, 256, %s19_s8, [#allocation3], %s452_s1, %s452_s1, %s453_s17  }
  0x24   :  { %s454_s20 = smov [#allocation7]   ;;  %s398_s24 = scalar_lea.hbm %s557_s3, 1024 }
  0x25   :  { %s44_s21 = sshll.u32 %s454_s20, 4  ;;  %p399_p2 = scmp.ne.s32.totalorder %s557_s3, %s398_s24  ;;  %s45_s21 = int_to_ptr.vmem [resolvable:$true] %s44_s21 }
  0x26   :  { %p402_p3 = scmp.lt.u32.totalorder %s398_s24, %s557_s3 }
  0x28   :  { %p404_p4 = pnand %p402_p3, %p399_p2 }
  0x2a   :  { %407 = shalt.err (!%p404_p4)
}
  0x2b   :  { %s408_s6 = scalar_lea.vmem %s45_s21, 1024  ;;  %p413_p6 = scmp.lt.s32.totalorder %s45_s21, %s45_s21 }
  0x2c   :  { %p409_p5 = scmp.ne.s32.totalorder %s45_s21, %s408_s6  ;;  %p414_p7 = scmp.lt.s32.totalorder %s408_s6, %s408_s6 }
  0x2e   :  { %p415_p8 = por %p414_p7, %p413_p6 }
  0x30   :  { %p416_p9 = pnand %p415_p8, %p409_p5 }
  0x32   :  { %419 = shalt.err (!%p416_p9)
}
  0x33   :  { %50 = dma.hbm_to_vmem [thread:$0]  %s557_s3, 1024, %s45_s21, [#allocation6], %s449_s28, %s449_s28, %s450_s29  }
  0x34   :  { %442 = dma.done.wait [#allocation3], 256  }
  0x35   :  { %443 = vsyncadd [#allocation3], 4294967040 }
  0x36   :  { %444 = dma.done.wait [#allocation6], 1280  }
  0x37   :  { %445 = vsyncadd [#allocation6], 4294966016  ;;  %v455_v0 = vmov 0.0   ;;  %vm456_vm0 = vmmov 0   ;;  %v340_v1 = vld [vmem:[#allocation5] sm:$0xff]   ;;  %v341_v2 = vld [vmem:[#allocation5 + $0x8] sm:$0xff]  }
  0x38   :  { %302 = vmatprep.subr.bf16.mxu0 %v455_v0  ;;  %306 = vmatprep.mubr.msk.bf16.mxu0 %vm456_vm0, %v455_v0  ;;  %v63_v3 = vld [vmem:[#allocation2] sm:$0xff]  ;;  %v64_v4 = vld [vmem:[#allocation2 + $0x8] sm:$0xff]  ;;  %vm89_vm1 = vcmask 261120   ;;  %v344_v8 = vld [vmem:[#allocation7 + $0x10] sm:$0xff]   ;;  %s457_s8 = smov [#allocation8]  }
  0x39   :  { %310 = vmatprep.subr.bf16.mxu1 %v455_v0  ;;  %326 = vmatprep.mubr.msk.bf16.mxu1 %vm456_vm0, %v455_v0  ;;  %v342_v5 = vld [vmem:[#allocation7] sm:$0xff]   ;;  %v343_v6 = vld [vmem:[#allocation7 + $0x8] sm:$0xff]   ;;  %v65_v7 = vpack.c.bf16 %v64_v4, %v63_v3  ;;  %v345_v9 = vld [vmem:[#allocation7 + $0x18] sm:$0xff]   ;;  %s264_s9 = sshll.u32 %s457_s8, 4  ;;  %s265_s9 = int_to_ptr.vmem [resolvable:$true] %s264_s9 }
  0x3a   :  { %303 = vmatpush3.bf16.msra.mxu0 %v340_v1  ;;  %311 = vmatpush3.bf16.msra.mxu1 %v342_v5  ;;  %v346_v10 = vld [vmem:[#allocation7 + $0x20] sm:$0xff]   ;;  %v347_v11 = vld [vmem:[#allocation7 + $0x28] sm:$0xff]   ;;  %v348_v12 = vld [vmem:[#allocation7 + $0x30] sm:$0xff]   ;;  %s420_s10 = scalar_lea.vmem %s265_s9, 256  ;;  %p425_p11 = scmp.lt.s32.totalorder %s265_s9, %s265_s9 }
  0x3b   :  { %304 = vmatprep.subr.bf16.mxu0 %v455_v0  ;;  %312 = vmatprep.subr.bf16.mxu1 %v455_v0  ;;  %v349_v13 = vld [vmem:[#allocation7 + $0x38] sm:$0xff]   ;;  %v277_v14 = vld [vmem:[%s556_s2] ss:$0 sm:$0xff]  ;;  %p421_p10 = scmp.ne.s32.totalorder %s265_s9, %s420_s10  ;;  %p426_p12 = scmp.lt.s32.totalorder %s420_s10, %s420_s10 }
  0x3c   :  { %v281_v32 = vld [vmem:[%s558_s4] ss:$0 sm:$0xff] }
  0x3d   :  { %p427_p13 = por %p426_p12, %p425_p11 }
  0x3e   :  { %305 = vmatpush3.bf16.msra.mxu0 %v341_v2  ;;  %313 = vmatpush3.bf16.msra.mxu1 %v343_v6 }
  0x3f   :  { %314 = vmatprep.subr.bf16.mxu1 %v455_v0  ;;  %p428_p0 = pnand %p427_p13, %p421_p10 }
  0x41   :  { %307 = vmatmul.mubr.msk.bf16.vlgmr.msra.gmra.mrb[0].mxu0 %vm89_vm1, %v65_v7 }
  0x42   :  { %315 = vmatpush3.bf16.msra.mxu1 %v344_v8 }
  0x43   :  { %316 = vmatprep.subr.bf16.mxu1 %v455_v0 }
  0x46   :  { %317 = vmatpush3.bf16.msra.mxu1 %v345_v9 }
  0x47   :  { %318 = vmatprep.subr.bf16.mxu1 %v455_v0 }
  0x4a   :  { %319 = vmatpush3.bf16.msra.mxu1 %v346_v10 }
  0x4b   :  { %320 = vmatprep.subr.bf16.mxu1 %v455_v0 }
  0x4e   :  { %321 = vmatpush3.bf16.msra.mxu1 %v347_v11 }
  0x4f   :  { %322 = vmatprep.subr.bf16.mxu1 %v455_v0 }
  0x52   :  { %323 = vmatpush3.bf16.msra.mxu1 %v348_v12 }
  0x53   :  { %324 = vmatprep.subr.bf16.mxu1 %v455_v0 }
  0x56   :  { %325 = vmatpush3.bf16.msra.mxu1 %v349_v13 }
 0x114   :  { %v127_v15 = vpop.f32.mrb[0].mxu0 }
 0x115   :  { %v128_v16 = vadd.f32 %v277_v14, %v127_v15  ;;  %v308_v17 = vpop.f32.mrb[1].mxu0 }
 0x116   :  { %v130_v18 = vpop.f32.mrb[2].mxu0 }
 0x117   :  { %v136_v19 = vmul.f32 0.70710677, %v128_v16  ;;  %v131_v20 = vadd.f32 %v277_v14, %v130_v18  ;;  %v309_v21 = vpop.f32.mrb[3].mxu0  ;;  %v134_v26 = vmul.f32 0.5, %v128_v16 }
 0x119   :  { %350 = verf.f32 %v136_v19  ;;  %v137_v22 = vmul.f32 0.70710677, %v131_v20  ;;  %v135_v27 = vmul.f32 0.5, %v131_v20 }
 0x11b   :  { %352 = verf.f32 %v137_v22 }
 0x123   :  { %v351_v23 = vpop.eup %350 }
 0x124   :  { %v140_v24 = vadd.f32 1.0, %v351_v23 }
 0x125   :  { %v353_v25 = vpop.eup %352 }
 0x126   :  { %v141_v28 = vadd.f32 1.0, %v353_v25  ;;  %v142_v29 = vmul.f32 %v140_v24, %v134_v26 }
 0x128   :  { %v143_v30 = vmul.f32 %v141_v28, %v135_v27 }
 0x12a   :  { %v144_v31 = vpack.c.bf16 %v143_v30, %v142_v29 }
 0x12c   :  { %327 = vmatmul.mubr.bf16.vlgmr.msra.gmra.mrb[0].mxu1 %v144_v31 }
 0x1ff   :  { %v250_v33 = vpop.f32.mrb[0].mxu1 }
 0x200   :  { %v251_v34 = vadd.f32 %v281_v32, %v250_v33  ;;  %v328_v35 = vpop.f32.mrb[1].mxu1 }
 0x201   :  { %v253_v36 = vpop.f32.mrb[2].mxu1 }
 0x202   :  { %257 = vst [vmem:[#allocation8] sm:$0xff] %v251_v34  ;;  %v254_v37 = vadd.f32 %v281_v32, %v253_v36  ;;  %v329_v38 = vpop.f32.mrb[3].mxu1 }
 0x204   :  { %258 = vst [vmem:[#allocation8 + $0x8] sm:$0xff] %v254_v37 }
 0x205   :  { %431 = shalt.err (!%p428_p0)
}
 0x206   :  { %s432_s12 = scalar_lea.hbm %s559_s5, 256 }
 0x207   :  { %p433_p1 = scmp.ne.s32.totalorder %s559_s5, %s432_s12  ;;  %p436_p2 = scmp.lt.u32.totalorder %s432_s12, %s559_s5 }
 0x209   :  { %p438_p3 = pnand %p436_p2, %p433_p1 }
 0x20b   :  { %441 = shalt.err (!%p438_p3)
}
 0x20c   :  { %270 = dma.vmem_to_hbm [thread:$0]  %s265_s9, 256, %s559_s5, [#allocation4], %s452_s1, %s452_s1, %s453_s17  }
 0x20d   :  { %446 = dma.done.wait [#allocation4], 256  }
 0x20e   :  { %447 = vsyncadd [#allocation4], 4294967040 }
 0x20f   :  { %274 = vsyncpa [#allocation3], 1 }
 0x210   :  { %275 = vsyncpa [#allocation6], 1 }
 0x211   :  { %276 = vsyncpa [#allocation4], 1 }

</bundles_post_ra>
